<compile_context>
chip_gen: v7x
topology: tpu7x:2x2x1
jax: 0.10.0
libtpu: 0.0.40
codegen_flags: <defaults>
</compile_context>

<pallas_src>
import functools

import jax
import jax.numpy as jnp
from jax.experimental import pallas as pl
from jax.experimental.pallas import tpu as pltpu


def _round_up(x, m):
    return ((x + m - 1) // m) * m


def _pad2(a, rows, cols):
    return jnp.pad(a, ((0, rows - a.shape[0]), (0, cols - a.shape[1])))


def _gelu_tanh(h):
    # TODO(synk): PyTorch nn.GELU() defaults to the exact erf form; tanh approximation
    # (EUP tanh) is used here, max abs error ~1e-3.
    c = jnp.float32(0.7978845608028654)  # sqrt(2/pi)
    a = jnp.float32(0.044715)
    return jnp.float32(0.5) * h * (jnp.float32(1.0) + jnp.tanh(c * (h + a * h * h * h)))


# ----------------------------------------------------------------------------
# Pallas kernel: quant(x) @ W1q*c1 + b1 -> GELU -> quant(h) @ W2q*c2 + b2_eff
# ----------------------------------------------------------------------------
def qmlp_swin_kernel(scal_ref,                          # SMEM (3,): 1/s1, 1/s2, -z2/s2
                     x_ref, w1_ref, c1_ref, b1_ref,     # VMEM inputs
                     w2_ref, c2_ref, b2_ref,
                     o_ref):                            # VMEM output
    inv_s1 = scal_ref[0]
    inv_s2 = scal_ref[1]
    nz2s2 = scal_ref[2]

    x = x_ref[...]

    # --- fc1 input fake-quant (symmetric int8): integer grid, exact in bf16 -------
    qx = jnp.clip(jnp.round(x * inv_s1), -128.0, 127.0).astype(jnp.bfloat16)

    # --- fc1 matmul on integer grids (bf16 operands, f32 MXU accumulation), then
    #     per-output-channel scale c1[j] = s1 * w1_scale[j] and bias ---------------
    w1 = w1_ref[...].astype(jnp.float32).astype(jnp.bfloat16)
    h = jnp.dot(qx, w1, preferred_element_type=jnp.float32)
    h = h * c1_ref[...] + b1_ref[...]

    # --- GELU ---------------------------------------------------------------------
    h = _gelu_tanh(h)

    # --- fc2 input fake-quant (asymmetric uint8, symmetric=False):
    #     integer grid q = round((h - z2) / s2) clamped to [0, 255] -----------------
    # TODO(synk): floating-point-offset fake-quant assumed to match the module's
    # LSQ symmetric=False semantics (vs. an integer zero-point inside the clamp).
    qh = jnp.clip(jnp.round(h * inv_s2 + nz2s2), 0.0, 255.0).astype(jnp.bfloat16)

    # --- fc2 matmul + per-channel scale c2[j] = s2 * w2_scale[j];
    #     the z2 offset term is pre-folded into b2_ref in the wrapper ---------------
    w2 = w2_ref[...].astype(jnp.float32).astype(jnp.bfloat16)
    y = jnp.dot(qh, w2, preferred_element_type=jnp.float32)
    y = y * c2_ref[...] + b2_ref[...]

    o_ref[...] = y.astype(o_ref.dtype)


# ----------------------------------------------------------------------------
# Parameter preparation (one-time weight quantization + scale/offset folding)
# ----------------------------------------------------------------------------
def quantize_weight_channelwise(w, bits=8):
    """Per-output-channel symmetric weight quantization ('statsq'-style max scale).

    w: (out_features, in_features) -- PyTorch nn.Linear layout.
    Returns (q, scale): int8 integer grid (out, in) and f32 scale (out, 1);
    dequantized weight = q * scale.
    """
    qmax = float(2 ** (bits - 1) - 1)  # 127
    scale = jnp.max(jnp.abs(w), axis=1, keepdims=True) / qmax
    scale = jnp.maximum(scale, 1e-8)
    q = jnp.clip(jnp.round(w / scale), -qmax, qmax).astype(jnp.int8)
    return q, scale.astype(jnp.float32)


def prepare_params(w1, b1, w2, b2, s1, s2, z2):
    """Quantize weights to int8, pad channel dims to 128, fold scales/offsets.

    w1: (H, Cin), b1: (H,), w2: (Cout, H), b2: (Cout,)  (PyTorch layouts).
    s1: fc1 input LSQ scale (symmetric int8); s2, z2: fc2 input LSQ scale/offset
    (asymmetric uint8).
    """
    H, Cin = w1.shape
    Cout, _ = w2.shape
    Cin_p, H_p, Cout_p = (_round_up(d, 128) for d in (Cin, H, Cout))

    q1, ws1 = quantize_weight_channelwise(w1)        # (H, Cin) int8, (H, 1) f32
    q2, ws2 = quantize_weight_channelwise(w2)        # (Cout, H) int8, (Cout, 1) f32

    w1_k = _pad2(q1.T, Cin_p, H_p)                   # (Cin_p, H_p) int8
    w2_k = _pad2(q2.T, H_p, Cout_p)                  # (H_p, Cout_p) int8

    c1 = _pad2(jnp.float32(s1) * ws1.T, 1, H_p)      # fc1 per-column post-scale
    b1_k = _pad2(jnp.asarray(b1, jnp.float32).reshape(1, -1), 1, H_p)

    c2 = _pad2(jnp.float32(s2) * ws2.T, 1, Cout_p)   # fc2 per-column post-scale
    # Fold the asymmetric activation offset z2 into the fc2 bias:
    #   sum_k (qh*s2 + z2)*q2[j,k]*ws2[j] = s2*ws2[j]*(qh@q2.T)[j] + z2*ws2[j]*colsum(q2)[j]
    colsum = jnp.sum(q2.astype(jnp.float32), axis=1).reshape(1, -1)   # (1, Cout)
    b2_eff = jnp.asarray(b2, jnp.float32).reshape(1, -1) + jnp.float32(z2) * ws2.T * colsum
    b2_k = _pad2(b2_eff, 1, Cout_p)

    scal = jnp.array([1.0 / s1, 1.0 / s2, -z2 / s2], dtype=jnp.float32)
    return (w1_k, c1, b1_k, w2_k, c2, b2_k, scal)


# ----------------------------------------------------------------------------
# pallas_call wrapper
# ----------------------------------------------------------------------------
@functools.partial(jax.jit, static_argnames=("out_features", "tile_m"))
def qmlp_swin_forward(x, params, out_features, tile_m=512):
    """x: (B, N, Cin) float32 -> (B, N, out_features) float32."""
    w1q, c1, b1, w2q, c2, b2, scal = params
    B, N, Cin = x.shape
    Cin_p, H_p = w1q.shape
    Cout_p = w2q.shape[1]

    M = B * N
    # Large token tiles; pad M so no trailing tokens are dropped.
    tile_eff = max(8, min(tile_m, _round_up(M, 8)))
    M_pad = _round_up(M, tile_eff)
    grid = (M_pad // tile_eff,)

    xf = x.reshape(M, Cin)
    xf = jnp.pad(xf, ((0, M_pad - M), (0, Cin_p - Cin)))

    # Explicit VMEM budget: double-buffered activation tiles + resident int8 weights.
    vmem_bytes = (
        2 * tile_eff * Cin_p * 4            # input tile, double-buffered
        + 2 * tile_eff * Cout_p * 4         # output tile, double-buffered
        + 2 * (Cin_p * H_p + H_p * Cout_p)  # int8 weights (worst case 2 buffers)
        + 2 * 2 * (H_p + Cout_p) * 4        # per-column scales + biases
    )
    vmem_limit = int(min(vmem_bytes + (8 << 20), 64 << 20))

    out = pl.pallas_call(
        qmlp_swin_kernel,
        out_shape=jax.ShapeDtypeStruct((M_pad, Cout_p), x.dtype),
        grid_spec=pltpu.PrefetchScalarGridSpec(
            num_scalar_prefetch=0,
            grid=grid,
            in_specs=[
                # packed activation-quant scalars in SMEM
                pl.BlockSpec(memory_space=pltpu.MemorySpace.SMEM),
                # token tile (lane-dense: channels padded to 128)
                pl.BlockSpec((tile_eff, Cin_p), lambda i: (i, 0)),
                # int8 weights + per-column scales / biases, resident across the grid
                # TODO(synk): for very large H, add an H-chunk grid axis with a
                # (tile_m, Cout) f32 accumulator (and single-buffer the weights) to
                # bound VMEM on v7x's 64 MiB.
                pl.BlockSpec((Cin_p, H_p), lambda i: (0, 0)),
                pl.BlockSpec((1, H_p), lambda i: (0, 0)),
                pl.BlockSpec((1, H_p), lambda i: (0, 0)),
                pl.BlockSpec((H_p, Cout_p), lambda i: (0, 0)),
                pl.BlockSpec((1, Cout_p), lambda i: (0, 0)),
                pl.BlockSpec((1, Cout_p), lambda i: (0, 0)),
            ],
            out_specs=pl.BlockSpec((tile_eff, Cout_p), lambda i: (i, 0)),
        ),
        compiler_params=pltpu.CompilerParams(
            dimension_semantics=("parallel",),
            vmem_limit_bytes=vmem_limit),
    )(scal, xf, w1q, c1, b1, w2q, c2, b2)

    return out[:M, :out_features].reshape(B, N, out_features)


# ----------------------------------------------------------------------------
# Plain-JAX reference (same integer-grid factorization == fake-quant MLP math)
# ----------------------------------------------------------------------------
def reference_forward(x, params, out_features):
    w1q, c1, b1, w2q, c2, b2, scal = params
    B, N, Cin = x.shape
    Cin_p = w1q.shape[0]
    xf = jnp.pad(x.reshape(B * N, Cin), ((0, 0), (0, Cin_p - Cin)))
    qx = jnp.clip(jnp.round(xf * scal[0]), -128.0, 127.0)
    h = (qx @ w1q.astype(jnp.float32)) * c1 + b1
    h = _gelu_tanh(h)
    qh = jnp.clip(jnp.round(h * scal[1] + scal[2]), 0.0, 255.0)
    y = (qh @ w2q.astype(jnp.float32)) * c2 + b2
    return y[:, :out_features].reshape(B, N, out_features)


if __name__ == "__main__":
    key = jax.random.PRNGKey(0)
    kx, kw1, kb1, kw2, kb2 = jax.random.split(key, 5)

    # Small Swin-like shapes: 2 windows x 64 tokens (8x8 window), C=32, hidden=4*C.
    B, N, Cin = 2, 64, 32
    H, Cout = 4 * Cin, Cin

    x = jax.random.normal(kx, (B, N, Cin), dtype=jnp.float32)

    # Deterministic synthetic parameters (PyTorch nn.Linear layout: (out, in)).
    w1 = jax.random.normal(kw1, (H, Cin), dtype=jnp.float32) * 0.05
    b1 = jax.random.normal(kb1, (H,), dtype=jnp.float32) * 0.02
    w2 = jax.random.normal(kw2, (Cout, H), dtype=jnp.float32) * 0.05
    b2 = jax.random.normal(kb2, (Cout,), dtype=jnp.float32) * 0.02

    # Activation-quant parameters ("learnable" LSQ params; deterministic init).
    # fc1: symmetric int8; fc2: asymmetric uint8 (GELU output min ~ -0.17).
    s1 = float(jnp.max(jnp.abs(x)) / 127.0)
    s2 = 4.0 / 255.0
    z2 = -0.2

    params = prepare_params(w1, b1, w2, b2, s1, s2, z2)

    y = qmlp_swin_forward(x, params, out_features=Cout)
    y = jax.block_until_ready(y)

    y_ref = reference_forward(x, params, Cout)
    assert y.shape == (B, N, Cout)
    err = jnp.abs(y - y_ref)
    # Tolerance allows for rare round()-boundary flips of a single uint8 quant step
    # caused by ULP-level tanh / fma differences between Pallas and XLA lowering.
    assert float(jnp.max(err)) < 1e-2, f"max err {float(jnp.max(err))}"
    assert float(jnp.mean(err)) < 1e-4, f"mean err {float(jnp.mean(err))}"

    print("KERNEL_OK")
</pallas_src>

<mosaic_0001>
module attributes {stable_mosaic.version = 11 : i64} {
  func.func @qmlp_swin_kernel(%arg0: i32, %arg1: memref<3xf32, #tpu.memory_space<smem>>, %arg2: memref<128x128xf32, #tpu.memory_space<vmem>>, %arg3: memref<128x128xi8, #tpu.memory_space<vmem>>, %arg4: memref<1x128xf32, #tpu.memory_space<vmem>>, %arg5: memref<1x128xf32, #tpu.memory_space<vmem>>, %arg6: memref<128x128xi8, #tpu.memory_space<vmem>>, %arg7: memref<1x128xf32, #tpu.memory_space<vmem>>, %arg8: memref<1x128xf32, #tpu.memory_space<vmem>>, %arg9: memref<128x128xf32, #tpu.memory_space<vmem>>) attributes {dimension_semantics = [#tpu.dimension_semantics<parallel>], iteration_bounds = array<i64: 1>, scalar_prefetch = 0 : i64, scratch_operands = 0 : i64, tpu.core_type = #tpu.core_type<tc>, window_params = [{transform_indices = @transform_0, window_bounds = array<i64: 3>}, {transform_indices = @transform_1, window_bounds = array<i64: 128, 128>}, {pipeline_mode = #tpu.pipeline_mode<synchronous>, transform_indices = @transform_2, window_bounds = array<i64: 128, 128>}, {pipeline_mode = #tpu.pipeline_mode<synchronous>, transform_indices = @transform_3, window_bounds = array<i64: 1, 128>}, {pipeline_mode = #tpu.pipeline_mode<synchronous>, transform_indices = @transform_4, window_bounds = array<i64: 1, 128>}, {pipeline_mode = #tpu.pipeline_mode<synchronous>, transform_indices = @transform_5, window_bounds = array<i64: 128, 128>}, {pipeline_mode = #tpu.pipeline_mode<synchronous>, transform_indices = @transform_6, window_bounds = array<i64: 1, 128>}, {pipeline_mode = #tpu.pipeline_mode<synchronous>, transform_indices = @transform_7, window_bounds = array<i64: 1, 128>}, {transform_indices = @transform_8, window_bounds = array<i64: 128, 128>}]} {
    %c0 = arith.constant 0 : index
    %0 = memref.load %arg1[%c0] : memref<3xf32, #tpu.memory_space<smem>>
    %c1 = arith.constant 1 : index
    %1 = memref.load %arg1[%c1] : memref<3xf32, #tpu.memory_space<smem>>
    %c2 = arith.constant 2 : index
    %2 = memref.load %arg1[%c2] : memref<3xf32, #tpu.memory_space<smem>>
    %c0_0 = arith.constant 0 : index
    %c0_1 = arith.constant 0 : index
    %3 = vector.load %arg2[%c0_0, %c0_1] : memref<128x128xf32, #tpu.memory_space<vmem>>, vector<128x128xf32>
    %4 = vector.broadcast %0 : f32 to vector<128x128xf32>
    %5 = arith.mulf %3, %4 : vector<128x128xf32>
    %6 = math.roundeven %5 : vector<128x128xf32>
    %cst = arith.constant -1.280000e+02 : f32
    %cst_2 = arith.constant 1.270000e+02 : f32
    %7 = vector.broadcast %cst : f32 to vector<128x128xf32>
    %8 = arith.maximumf %7, %6 : vector<128x128xf32>
    %9 = vector.broadcast %cst_2 : f32 to vector<128x128xf32>
    %10 = arith.minimumf %9, %8 : vector<128x128xf32>
    %11 = arith.truncf %10 : vector<128x128xf32> to vector<128x128xbf16>
    %c0_3 = arith.constant 0 : index
    %c0_4 = arith.constant 0 : index
    %12 = vector.load %arg3[%c0_3, %c0_4] : memref<128x128xi8, #tpu.memory_space<vmem>>, vector<128x128xi8>
    %13 = arith.sitofp %12 : vector<128x128xi8> to vector<128x128xf32>
    %14 = arith.truncf %13 : vector<128x128xf32> to vector<128x128xbf16>
    %cst_5 = arith.constant dense<0.000000e+00> : vector<128x128xf32>
    %15 = tpu.matmul %11, %14, %cst_5 {dimension_numbers = #tpu.dot_dimension_numbers<[1], [0], [0], [1], [0, 0, 1, 1], [], []>} : vector<128x128xbf16>, vector<128x128xbf16>, vector<128x128xf32> -> vector<128x128xf32>
    %c0_6 = arith.constant 0 : index
    %c0_7 = arith.constant 0 : index
    %16 = vector.load %arg4[%c0_6, %c0_7] : memref<1x128xf32, #tpu.memory_space<vmem>>, vector<1x128xf32>
    %17 = vector.broadcast %16 : vector<1x128xf32> to vector<128x128xf32>
    %18 = arith.mulf %15, %17 : vector<128x128xf32>
    %c0_8 = arith.constant 0 : index
    %c0_9 = arith.constant 0 : index
    %19 = vector.load %arg5[%c0_8, %c0_9] : memref<1x128xf32, #tpu.memory_space<vmem>>, vector<1x128xf32>
    %20 = vector.broadcast %19 : vector<1x128xf32> to vector<128x128xf32>
    %21 = arith.addf %18, %20 : vector<128x128xf32>
    %cst_10 = arith.constant 5.000000e-01 : f32
    %22 = vector.broadcast %cst_10 : f32 to vector<128x128xf32>
    %23 = arith.mulf %22, %21 : vector<128x128xf32>
    %cst_11 = arith.constant 4.471500e-02 : f32
    %24 = vector.broadcast %cst_11 : f32 to vector<128x128xf32>
    %25 = arith.mulf %24, %21 : vector<128x128xf32>
    %26 = arith.mulf %25, %21 : vector<128x128xf32>
    %27 = arith.mulf %26, %21 : vector<128x128xf32>
    %28 = arith.addf %21, %27 : vector<128x128xf32>
    %cst_12 = arith.constant 0.797884583 : f32
    %29 = vector.broadcast %cst_12 : f32 to vector<128x128xf32>
    %30 = arith.mulf %29, %28 : vector<128x128xf32>
    %31 = math.tanh %30 : vector<128x128xf32>
    %cst_13 = arith.constant 1.000000e+00 : f32
    %32 = vector.broadcast %cst_13 : f32 to vector<128x128xf32>
    %33 = arith.addf %32, %31 : vector<128x128xf32>
    %34 = arith.mulf %23, %33 : vector<128x128xf32>
    %35 = vector.broadcast %1 : f32 to vector<128x128xf32>
    %36 = arith.mulf %34, %35 : vector<128x128xf32>
    %37 = vector.broadcast %2 : f32 to vector<128x128xf32>
    %38 = arith.addf %36, %37 : vector<128x128xf32>
    %39 = math.roundeven %38 : vector<128x128xf32>
    %cst_14 = arith.constant 0.000000e+00 : f32
    %cst_15 = arith.constant 2.550000e+02 : f32
    %40 = vector.broadcast %cst_14 : f32 to vector<128x128xf32>
    %41 = arith.maximumf %40, %39 : vector<128x128xf32>
    %42 = vector.broadcast %cst_15 : f32 to vector<128x128xf32>
    %43 = arith.minimumf %42, %41 : vector<128x128xf32>
    %44 = arith.truncf %43 : vector<128x128xf32> to vector<128x128xbf16>
    %c0_16 = arith.constant 0 : index
    %c0_17 = arith.constant 0 : index
    %45 = vector.load %arg6[%c0_16, %c0_17] : memref<128x128xi8, #tpu.memory_space<vmem>>, vector<128x128xi8>
    %46 = arith.sitofp %45 : vector<128x128xi8> to vector<128x128xf32>
    %47 = arith.truncf %46 : vector<128x128xf32> to vector<128x128xbf16>
    %cst_18 = arith.constant dense<0.000000e+00> : vector<128x128xf32>
    %48 = tpu.matmul %44, %47, %cst_18 {dimension_numbers = #tpu.dot_dimension_numbers<[1], [0], [0], [1], [0, 0, 1, 1], [], []>} : vector<128x128xbf16>, vector<128x128xbf16>, vector<128x128xf32> -> vector<128x128xf32>
    %c0_19 = arith.constant 0 : index
    %c0_20 = arith.constant 0 : index
    %49 = vector.load %arg7[%c0_19, %c0_20] : memref<1x128xf32, #tpu.memory_space<vmem>>, vector<1x128xf32>
    %50 = vector.broadcast %49 : vector<1x128xf32> to vector<128x128xf32>
    %51 = arith.mulf %48, %50 : vector<128x128xf32>
    %c0_21 = arith.constant 0 : index
    %c0_22 = arith.constant 0 : index
    %52 = vector.load %arg8[%c0_21, %c0_22] : memref<1x128xf32, #tpu.memory_space<vmem>>, vector<1x128xf32>
    %53 = vector.broadcast %52 : vector<1x128xf32> to vector<128x128xf32>
    %54 = arith.addf %51, %53 : vector<128x128xf32>
    %c0_23 = arith.constant 0 : index
    %c0_24 = arith.constant 0 : index
    %55 = vector.load %arg9[%c0_23, %c0_24] : memref<128x128xf32, #tpu.memory_space<vmem>>, vector<128x128xf32>
    tpu.vector_store %arg9[%c0_23, %c0_24], %54 {strides = array<i32>} : memref<128x128xf32, #tpu.memory_space<vmem>>, vector<128x128xf32>,
    return
  }
  func.func @transform_0(%arg0: i32) -> i32 {
    %c0_i32 = arith.constant 0 : i32
    %c0_i32_0 = arith.constant 0 : i32
    return %c0_i32 : i32
  }
  func.func @transform_1(%arg0: i32) -> (i32, i32) {
    %c0_i32 = arith.constant 0 : i32
    %c0_i32_0 = arith.constant 0 : i32
    return %arg0, %c0_i32 : i32, i32
  }
  func.func @transform_2(%arg0: i32) -> (i32, i32) {
    %c0_i32 = arith.constant 0 : i32
    %c0_i32_0 = arith.constant 0 : i32
    %c0_i32_1 = arith.constant 0 : i32
    return %c0_i32, %c0_i32_0 : i32, i32
  }
  func.func @transform_3(%arg0: i32) -> (i32, i32) {
    %c0_i32 = arith.constant 0 : i32
    %c0_i32_0 = arith.constant 0 : i32
    %c0_i32_1 = arith.constant 0 : i32
    return %c0_i32, %c0_i32_0 : i32, i32
  }
  func.func @transform_4(%arg0: i32) -> (i32, i32) {
    %c0_i32 = arith.constant 0 : i32
    %c0_i32_0 = arith.constant 0 : i32
    %c0_i32_1 = arith.constant 0 : i32
    return %c0_i32, %c0_i32_0 : i32, i32
  }
  func.func @transform_5(%arg0: i32) -> (i32, i32) {
    %c0_i32 = arith.constant 0 : i32
    %c0_i32_0 = arith.constant 0 : i32
    %c0_i32_1 = arith.constant 0 : i32
    return %c0_i32, %c0_i32_0 : i32, i32
  }
  func.func @transform_6(%arg0: i32) -> (i32, i32) {
    %c0_i32 = arith.constant 0 : i32
    %c0_i32_0 = arith.constant 0 : i32
    %c0_i32_1 = arith.constant 0 : i32
    return %c0_i32, %c0_i32_0 : i32, i32
  }
  func.func @transform_7(%arg0: i32) -> (i32, i32) {
    %c0_i32 = arith.constant 0 : i32
    %c0_i32_0 = arith.constant 0 : i32
    %c0_i32_1 = arith.constant 0 : i32
    return %c0_i32, %c0_i32_0 : i32, i32
  }
  func.func @transform_8(%arg0: i32) -> (i32, i32) {
    %c0_i32 = arith.constant 0 : i32
    %c0_i32_0 = arith.constant 0 : i32
    return %arg0, %c0_i32 : i32, i32
  }
}

</mosaic_0001>

<bundles_post_ra>
// kernel: qmlp_swin_forward.1
= control target key start
LH: loop header
LB: loop body
LE: loop exit
PB: predicated region body
PF: predicated region fallthrough
CT: control target
= control target key end

     0   :  { %13 = vsyncpa [#allocation3], 0  ;;  %s1251_s0 = inlined_call_operand.vmem [shape: f32[3], index: 0, kind: input, shape index: {}]   ;;  %s1252_s1 = inlined_call_operand.vmem [shape: f32[128,128], index: 1, kind: input, shape index: {}]   ;;  %s1253_s2 = inlined_call_operand.vmem [shape: s8[128,128], index: 2, kind: input, shape index: {}]   ;;  %s1254_s3 = inlined_call_operand.vmem [shape: f32[1,128], index: 3, kind: input, shape index: {}]   ;;  %s1255_s4 = inlined_call_operand.vmem [shape: f32[1,128], index: 4, kind: input, shape index: {}]   ;;  %s1256_s5 = inlined_call_operand.vmem [shape: s8[128,128], index: 5, kind: input, shape index: {}]   ;;  %s1257_s6 = inlined_call_operand.vmem [shape: f32[1,128], index: 6, kind: input, shape index: {}]   ;;  %s1258_s7 = inlined_call_operand.vmem [shape: f32[1,128], index: 7, kind: input, shape index: {}]   ;;  %s1259_s8 = inlined_call_operand.vmem [shape: f32[128,128], index: 8, kind: output, shape index: {}]  }
   0x1   :  { %s20_s29 = sshll.u32 %s1251_s0, 4  ;;  %s21_s29 = int_to_ptr.vmem [resolvable:$true] %s20_s29 }
   0x2   :  { %s867_s30 = scalar_lea.vmem %s21_s29, 16  ;;  %p872_p1 = scmp.lt.s32.totalorder %s21_s29, %s21_s29 }
   0x3   :  { %p868_p0 = scmp.ne.s32.totalorder %s21_s29, %s867_s30  ;;  %p873_p2 = scmp.lt.s32.totalorder %s867_s30, %s867_s30 }
   0x5   :  { %p874_p3 = por %p873_p2, %p872_p1 }
   0x7   :  { %p875_p4 = pnand %p874_p3, %p868_p0 }
   0x9   :  { %878 = shalt.err (!%p875_p4)
}
   0xa   :  { %s881_s9 = smov [#allocation2]  }
   0xb   :  { %23 = dma.vmem_to_smem %s21_s29, 16, %s881_s9, [#allocation3]  }
   0xc   :  { %879 = dma.done.wait [#allocation3], 16  }
   0xd   :  { %880 = vsyncadd [#allocation3], 4294967280 }
   0xe   :  { %41 = sfence }
   0xf   :  { %v135_v0 = vld [vmem:[%s1253_s2] sm:$0xff]  ;;  %s43_s12 = sld [smem:[#allocation2]]  ;;  %v136_v3 = vld [vmem:[%s1253_s2 + $0x8] sm:$0xff]  ;;  %v137_v13 = vld [vmem:[%s1253_s2 + $0x10] sm:$0xff]  ;;  %s700_s0 = sld [smem:[#allocation2 + $0x1]] }
  0x10   :  { %v139_v1 = vunpack.c.l.s8.bf16 %v135_v0  ;;  %v140_v2 = vunpack.c.h.s8.bf16 %v135_v0  ;;  %v46_v4 = vld [vmem:[%s1252_s1] sm:$0xff]  ;;  %v47_v5 = vld [vmem:[%s1252_s1 + $0x8] sm:$0xff]  ;;  %v141_v6 = vunpack.c.l.s8.bf16 %v136_v3  ;;  %v142_v10 = vunpack.c.h.s8.bf16 %v136_v3  ;;  %v48_v16 = vld [vmem:[%s1252_s1 + $0x10] sm:$0xff] }
  0x11   :  { %v49_v17 = vld [vmem:[%s1252_s1 + $0x18] sm:$0xff]  ;;  %v50_v18 = vld [vmem:[%s1252_s1 + $0x20] sm:$0xff]  ;;  %v51_v19 = vld [vmem:[%s1252_s1 + $0x28] sm:$0xff]  ;;  %v143_v20 = vunpack.c.l.s8.bf16 %v137_v13  ;;  %v144_v28 = vunpack.c.h.s8.bf16 %v137_v13 }
  0x12   :  { %738 = vmatprep.subr.bf16.mxu0 %v139_v1  ;;  %v138_v29 = vld [vmem:[%s1253_s2 + $0x18] sm:$0xff]  ;;  %v52_v34 = vld [vmem:[%s1252_s1 + $0x30] sm:$0xff]  ;;  %v54_v37 = vld [vmem:[%s1252_s1 + $0x40] sm:$0xff]  ;;  %s701_s2 = sld [smem:[#allocation2 + $0x2]] }
  0x13   :  { %739 = vmatpush3.bf16.msra.mxu0 %v139_v1  ;;  %v53_v35 = vld [vmem:[%s1252_s1 + $0x38] sm:$0xff]  ;;  %v145_v36 = vunpack.c.l.s8.bf16 %v138_v29  ;;  %v55_v38 = vld [vmem:[%s1252_s1 + $0x48] sm:$0xff]  ;;  %v146_v47 = vunpack.c.h.s8.bf16 %v138_v29  ;;  %v56_v56 = vld [vmem:[%s1252_s1 + $0x50] sm:$0xff] }
  0x14   :  { %740 = vmatprep.subr.bf16.mxu0 %v140_v2  ;;  %v57_v57 = vld [vmem:[%s1252_s1 + $0x58] sm:$0xff]  ;;  %v58_v58 = vld [vmem:[%s1252_s1 + $0x60] sm:$0xff]  ;;  %v59_v59 = vld [vmem:[%s1252_s1 + $0x68] sm:$0xff] }
  0x15   :  { %v942_v7 = vstv %s43_s12 }
  0x16   :  { %v63_v8 = vmul.f32 %v942_v7, %v46_v4  ;;  %v64_v9 = vmul.f32 %v942_v7, %v47_v5  ;;  %v65_v23 = vmul.f32 %v942_v7, %v48_v16  ;;  %v66_v25 = vmul.f32 %v942_v7, %v49_v17  ;;  %v61_v16 = vld [vmem:[%s1252_s1 + $0x78] sm:$0xff] }
  0x17   :  { %741 = vmatpush3.bf16.msra.mxu0 %v140_v2  ;;  %v67_v26 = vmul.f32 %v942_v7, %v50_v18  ;;  %v68_v27 = vmul.f32 %v942_v7, %v51_v19  ;;  %v69_v39 = vmul.f32 %v942_v7, %v52_v34  ;;  %v70_v40 = vmul.f32 %v942_v7, %v53_v35 }
  0x18   :  { %742 = vmatprep.subr.bf16.mxu0 %v141_v6  ;;  %v802_v11 = vround.rtne.f32 %v63_v8  ;;  %v803_v12 = vround.rtne.f32 %v64_v9  ;;  %v804_v30 = vround.rtne.f32 %v65_v23  ;;  %v805_v31 = vround.rtne.f32 %v66_v25 }
  0x19   :  { %v806_v32 = vround.rtne.f32 %v67_v26  ;;  %v807_v33 = vround.rtne.f32 %v68_v27  ;;  %v71_v45 = vmul.f32 %v942_v7, %v54_v37  ;;  %v72_v46 = vmul.f32 %v942_v7, %v55_v38  ;;  %v524_v37 = vld [vmem:[%s1256_s5] sm:$0xff] }
  0x1a   :  { %v95_v14 = vmax.f32 %v802_v11, -128.0  ;;  %v96_v15 = vmax.f32 %v803_v12, -128.0  ;;  %v97_v41 = vmax.f32 %v804_v30, -128.0  ;;  %v98_v42 = vmax.f32 %v805_v31, -128.0 }
  0x1b   :  { %743 = vmatpush3.bf16.msra.mxu0 %v141_v6  ;;  %v99_v43 = vmax.f32 %v806_v32, -128.0  ;;  %v100_v44 = vmax.f32 %v807_v33, -128.0  ;;  %v808_v48 = vround.rtne.f32 %v69_v39  ;;  %v809_v49 = vround.rtne.f32 %v70_v40  ;;  %v525_v40 = vld [vmem:[%s1256_s5 + $0x8] sm:$0xff] }
  0x1c   :  { %744 = vmatprep.subr.bf16.mxu0 %v142_v10  ;;  %v111_v21 = vmin.f32 %v95_v14, 127.0  ;;  %v112_v22 = vmin.f32 %v96_v15, 127.0  ;;  %v113_v50 = vmin.f32 %v97_v41, 127.0  ;;  %v114_v51 = vmin.f32 %v98_v42, 127.0  ;;  %v60_v15 = vld [vmem:[%s1252_s1 + $0x70] sm:$0xff] }
  0x1d   :  { %v115_v52 = vmin.f32 %v99_v43, 127.0  ;;  %v116_v53 = vmin.f32 %v100_v44, 127.0  ;;  %v810_v54 = vround.rtne.f32 %v71_v45  ;;  %v811_v55 = vround.rtne.f32 %v72_v46  ;;  %v526_v43 = vld [vmem:[%s1256_s5 + $0x10] sm:$0xff]  ;;  %v527_v46 = vld [vmem:[%s1256_s5 + $0x18] sm:$0xff] }
  0x1e   :  { %v127_v24 = vpack.c.bf16 %v112_v22, %v111_v21  ;;  %v101_v60 = vmax.f32 %v808_v48, -128.0  ;;  %v102_v61 = vmax.f32 %v809_v49, -128.0  ;;  %v128_v62 = vpack.c.bf16 %v114_v51, %v113_v50  ;;  %v1023_v49 = vld [vmem:[%s1254_s3] ss:$0 sm:$0xff] }
  0x1f   :  { %745 = vmatpush3.bf16.msra.mxu0 %v142_v10  ;;  %v129_v63 = vpack.c.bf16 %v116_v53, %v115_v52  ;;  %v73_v0 = vmul.f32 %v942_v7, %v56_v56  ;;  %v74_v1 = vmul.f32 %v942_v7, %v57_v57  ;;  %v103_v2 = vmax.f32 %v810_v54, -128.0  ;;  %v1028_v51 = vld [vmem:[%s1255_s4] ss:$0 sm:$0xff] }
  0x20   :  { %746 = vmatprep.subr.bf16.mxu0 %v143_v20  ;;  %754 = vmatprep.mubr.bf16.mxu0 %v127_v24  ;;  %v104_v3 = vmax.f32 %v811_v55, -128.0  ;;  %v75_v4 = vmul.f32 %v942_v7, %v58_v58  ;;  %v76_v5 = vmul.f32 %v942_v7, %v59_v59  ;;  %v117_v6 = vmin.f32 %v101_v60, 127.0 }
  0x21   :  { %v118_v8 = vmin.f32 %v102_v61, 127.0  ;;  %v812_v9 = vround.rtne.f32 %v73_v0  ;;  %v813_v10 = vround.rtne.f32 %v74_v1  ;;  %v119_v11 = vmin.f32 %v103_v2, 127.0 }
  0x22   :  { %v120_v12 = vmin.f32 %v104_v3, 127.0  ;;  %v814_v13 = vround.rtne.f32 %v75_v4  ;;  %v815_v14 = vround.rtne.f32 %v76_v5  ;;  %v78_v21 = vmul.f32 %v942_v7, %v61_v16 }
  0x23   :  { %747 = vmatpush3.bf16.msra.mxu0 %v143_v20  ;;  %v130_v17 = vpack.c.bf16 %v118_v8, %v117_v6  ;;  %v105_v18 = vmax.f32 %v812_v9, -128.0  ;;  %v106_v19 = vmax.f32 %v813_v10, -128.0  ;;  %v77_v20 = vmul.f32 %v942_v7, %v60_v15 }
  0x24   :  { %748 = vmatprep.subr.bf16.mxu0 %v144_v28  ;;  %v131_v22 = vpack.c.bf16 %v120_v12, %v119_v11  ;;  %v107_v23 = vmax.f32 %v814_v13, -128.0  ;;  %v108_v24 = vmax.f32 %v815_v14, -128.0  ;;  %v528_v38 = vunpack.c.l.s8.bf16 %v524_v37 }
  0x25   :  { %v121_v25 = vmin.f32 %v105_v18, 127.0  ;;  %v122_v26 = vmin.f32 %v106_v19, 127.0  ;;  %v816_v27 = vround.rtne.f32 %v77_v20  ;;  %v529_v39 = vunpack.c.h.s8.bf16 %v524_v37 }
  0x26   :  { %v123_v29 = vmin.f32 %v107_v23, 127.0  ;;  %v124_v30 = vmin.f32 %v108_v24, 127.0  ;;  %770 = vmatprep.subr.bf16.mxu1 %v528_v38  ;;  %v530_v41 = vunpack.c.l.s8.bf16 %v525_v40  ;;  %v531_v42 = vunpack.c.h.s8.bf16 %v525_v40 }
  0x27   :  { %749 = vmatpush3.bf16.msra.mxu0 %v144_v28  ;;  %v817_v28 = vround.rtne.f32 %v78_v21  ;;  %v132_v31 = vpack.c.bf16 %v122_v26, %v121_v25  ;;  %v109_v32 = vmax.f32 %v816_v27, -128.0  ;;  %771 = vmatpush3.bf16.msra.mxu1 %v528_v38  ;;  %v532_v44 = vunpack.c.l.s8.bf16 %v526_v43 }
  0x28   :  { %750 = vmatprep.subr.bf16.mxu0 %v145_v36  ;;  %v133_v34 = vpack.c.bf16 %v124_v30, %v123_v29  ;;  %772 = vmatprep.subr.bf16.mxu1 %v529_v39  ;;  %v533_v45 = vunpack.c.h.s8.bf16 %v526_v43  ;;  %v535_v48 = vunpack.c.h.s8.bf16 %v527_v46  ;;  %v1038_v3 = vstv %s700_s0 }
  0x29   :  { %v110_v33 = vmax.f32 %v817_v28, -128.0  ;;  %v125_v35 = vmin.f32 %v109_v32, 127.0  ;;  %v1040_v4 = vstv %s701_s2 }
  0x2b   :  { %751 = vmatpush3.bf16.msra.mxu0 %v145_v36  ;;  %v126_v36 = vmin.f32 %v110_v33, 127.0  ;;  %773 = vmatpush3.bf16.msra.mxu1 %v529_v39 }
  0x2c   :  { %752 = vmatprep.subr.bf16.mxu0 %v146_v47  ;;  %774 = vmatprep.subr.bf16.mxu1 %v530_v41 }
  0x2d   :  { %v134_v7 = vpack.c.bf16 %v126_v36, %v125_v35 }
  0x2f   :  { %753 = vmatpush3.bf16.msra.mxu0 %v146_v47  ;;  %775 = vmatpush3.bf16.msra.mxu1 %v530_v41  ;;  %v534_v47 = vunpack.c.l.s8.bf16 %v527_v46 }
  0x30   :  { %776 = vmatprep.subr.bf16.mxu1 %v531_v42 }
  0x32   :  { %755 = vmatmul.mubr.bf16.vlgmr.msra.gmra.mrb[0].mxu0 %v128_v62 }
  0x33   :  { %758 = vmatprep.mubr.bf16.mxu0 %v129_v63  ;;  %777 = vmatpush3.bf16.msra.mxu1 %v531_v42 }
  0x34   :  { %778 = vmatprep.subr.bf16.mxu1 %v532_v44 }
  0x37   :  { %779 = vmatpush3.bf16.msra.mxu1 %v532_v44 }
  0x38   :  { %780 = vmatprep.subr.bf16.mxu1 %v533_v45 }
  0x3a   :  { %759 = vmatmul.mubr.bf16.gmra.mrb[4].mxu0 %v130_v17 }
  0x3b   :  { %762 = vmatprep.mubr.bf16.mxu0 %v131_v22  ;;  %781 = vmatpush3.bf16.msra.mxu1 %v533_v45 }
  0x3c   :  { %782 = vmatprep.subr.bf16.mxu1 %v534_v47 }
  0x3f   :  { %783 = vmatpush3.bf16.msra.mxu1 %v534_v47 }
  0x40   :  { %784 = vmatprep.subr.bf16.mxu1 %v535_v48 }
  0x42   :  { %763 = vmatmul.mubr.bf16.gmra.mrb[8].mxu0 %v132_v31 }
  0x43   :  { %766 = vmatprep.mubr.bf16.mxu0 %v133_v34  ;;  %785 = vmatpush3.bf16.msra.mxu1 %v535_v48 }
  0x4a   :  { %767 = vmatmul.mubr.bf16.gmra.mrb[12].mxu0 %v134_v7 }
 0x105   :  { %v756_v50 = vpop.f32.mrb[0].mxu0 }
 0x106   :  { %v253_v52 = vmul.f32 %v756_v50, %v1023_v49  ;;  %v181_v53 = vpop.f32.mrb[1].mxu0 }
 0x107   :  { %v251_v54 = vmul.f32 %v1023_v49, %v181_v53  ;;  %v757_v55 = vpop.f32.mrb[2].mxu0 }
 0x108   :  { %v276_v56 = vadd.f32 %v1028_v51, %v253_v52  ;;  %v254_v57 = vmul.f32 %v757_v55, %v1023_v49  ;;  %v184_v58 = vpop.f32.mrb[3].mxu0 }
 0x109   :  { %v274_v59 = vadd.f32 %v1028_v51, %v251_v54  ;;  %v252_v60 = vmul.f32 %v1023_v49, %v184_v58 }
 0x10a   :  { %v308_v61 = vmul.f32 0.044715, %v276_v56  ;;  %v277_v62 = vadd.f32 %v1028_v51, %v254_v57  ;;  %v1044_v10 = vmul.f32 0.5, %v276_v56 }
 0x10b   :  { %v306_v63 = vmul.f32 0.044715, %v274_v59  ;;  %v275_v0 = vadd.f32 %v1028_v51, %v252_v60  ;;  %v1042_v9 = vmul.f32 0.5, %v274_v59 }
 0x10c   :  { %v324_v1 = vmul.f32 %v308_v61, %v276_v56  ;;  %v309_v2 = vmul.f32 0.044715, %v277_v62  ;;  %v1047_v15 = vmul.f32 0.5, %v277_v62 }
 0x10d   :  { %v322_v5 = vmul.f32 %v306_v63, %v274_v59  ;;  %v307_v6 = vmul.f32 0.044715, %v275_v0  ;;  %v760_v8 = vpop.f32.mrb[4].mxu0  ;;  %v1050_v20 = vmul.f32 0.5, %v275_v0 }
 0x10e   :  { %v340_v11 = vmul.f32 %v324_v1, %v276_v56  ;;  %v325_v12 = vmul.f32 %v309_v2, %v277_v62  ;;  %v257_v13 = vmul.f32 %v760_v8, %v1023_v49  ;;  %v197_v14 = vpop.f32.mrb[5].mxu0 }
 0x10f   :  { %v338_v16 = vmul.f32 %v322_v5, %v274_v59  ;;  %v323_v17 = vmul.f32 %v307_v6, %v275_v0  ;;  %v255_v18 = vmul.f32 %v1023_v49, %v197_v14  ;;  %v761_v19 = vpop.f32.mrb[6].mxu0 }
 0x110   :  { %v356_v21 = vadd.f32 %v340_v11, %v276_v56  ;;  %v341_v22 = vmul.f32 %v325_v12, %v277_v62  ;;  %v1053_v23 = vadd.f32 %v1028_v51, %v257_v13  ;;  %v258_v24 = vmul.f32 %v761_v19, %v1023_v49  ;;  %v200_v25 = vpop.f32.mrb[7].mxu0 }
 0x111   :  { %v339_v26 = vmul.f32 %v323_v17, %v275_v0  ;;  %v1057_v27 = vadd.f32 %v1028_v51, %v255_v18  ;;  %v256_v28 = vmul.f32 %v1023_v49, %v200_v25  ;;  %v354_v29 = vadd.f32 %v338_v16, %v274_v59 }
 0x112   :  { %v372_v30 = vmul.f32 0.7978846, %v356_v21  ;;  %v357_v31 = vadd.f32 %v341_v22, %v277_v62  ;;  %v312_v32 = vmul.f32 0.044715, %v1053_v23  ;;  %v1062_v33 = vadd.f32 %v1028_v51, %v258_v24 }
 0x113   :  { %v310_v34 = vmul.f32 0.044715, %v1057_v27  ;;  %v1066_v35 = vadd.f32 %v1028_v51, %v256_v28  ;;  %v355_v36 = vadd.f32 %v339_v26, %v275_v0  ;;  %v370_v7 = vmul.f32 0.7978846, %v354_v29 }
 0x114   :  { %835 = vtanh.f32 %v372_v30  ;;  %v373_v37 = vmul.f32 0.7978846, %v357_v31  ;;  %v328_v38 = vmul.f32 %v312_v32, %v1053_v23  ;;  %v313_v39 = vmul.f32 0.044715, %v1062_v33 }
 0x115   :  { %v326_v40 = vmul.f32 %v310_v34, %v1057_v27  ;;  %v311_v41 = vmul.f32 0.044715, %v1066_v35  ;;  %v764_v42 = vpop.f32.mrb[8].mxu0  ;;  %v371_v43 = vmul.f32 0.7978846, %v355_v36  ;;  %837 = vtanh.f32 %v370_v7 }
 0x116   :  { %839 = vtanh.f32 %v373_v37  ;;  %v344_v44 = vmul.f32 %v328_v38, %v1053_v23  ;;  %v329_v45 = vmul.f32 %v313_v39, %v1062_v33  ;;  %v261_v46 = vmul.f32 %v764_v42, %v1023_v49  ;;  %v213_v47 = vpop.f32.mrb[9].mxu0 }
 0x117   :  { %v342_v48 = vmul.f32 %v326_v40, %v1057_v27  ;;  %v327_v50 = vmul.f32 %v311_v41, %v1066_v35  ;;  %v259_v52 = vmul.f32 %v1023_v49, %v213_v47  ;;  %v765_v53 = vpop.f32.mrb[10].mxu0  ;;  %841 = vtanh.f32 %v371_v43 }
 0x118   :  { %v360_v54 = vadd.f32 %v344_v44, %v1053_v23  ;;  %v345_v55 = vmul.f32 %v329_v45, %v1062_v33  ;;  %v1081_v56 = vadd.f32 %v1028_v51, %v261_v46  ;;  %v262_v57 = vmul.f32 %v765_v53, %v1023_v49  ;;  %v216_v58 = vpop.f32.mrb[11].mxu0 }
 0x119   :  { %v358_v59 = vadd.f32 %v342_v48, %v1057_v27  ;;  %v343_v60 = vmul.f32 %v327_v50, %v1066_v35  ;;  %v1087_v61 = vadd.f32 %v1028_v51, %v259_v52  ;;  %v260_v62 = vmul.f32 %v1023_v49, %v216_v58 }
 0x11a   :  { %v376_v63 = vmul.f32 0.7978846, %v360_v54  ;;  %v361_v0 = vadd.f32 %v345_v55, %v1062_v33  ;;  %v316_v1 = vmul.f32 0.044715, %v1081_v56  ;;  %v1093_v2 = vadd.f32 %v1028_v51, %v262_v57 }
 0x11b   :  { %v374_v5 = vmul.f32 0.7978846, %v358_v59  ;;  %v359_v6 = vadd.f32 %v343_v60, %v1066_v35  ;;  %v314_v8 = vmul.f32 0.044715, %v1087_v61  ;;  %v1098_v11 = vadd.f32 %v1028_v51, %v260_v62 }
 0x11c   :  { %843 = vtanh.f32 %v376_v63  ;;  %v377_v12 = vmul.f32 0.7978846, %v361_v0  ;;  %v332_v13 = vmul.f32 %v316_v1, %v1081_v56  ;;  %v317_v14 = vmul.f32 0.044715, %v1093_v2 }
 0x11d   :  { %845 = vtanh.f32 %v374_v5  ;;  %v375_v16 = vmul.f32 0.7978846, %v359_v6  ;;  %v330_v17 = vmul.f32 %v314_v8, %v1087_v61  ;;  %v315_v18 = vmul.f32 0.044715, %v1098_v11  ;;  %v768_v19 = vpop.f32.mrb[12].mxu0 }
 0x11e   :  { %v836_v21 = vpop.eup %835  ;;  %847 = vtanh.f32 %v377_v12  ;;  %v348_v22 = vmul.f32 %v332_v13, %v1081_v56  ;;  %v333_v24 = vmul.f32 %v317_v14, %v1093_v2  ;;  %v265_v25 = vmul.f32 %v768_v19, %v1023_v49  ;;  %v229_v26 = vpop.f32.mrb[13].mxu0 }
 0x11f   :  { %v838_v28 = vpop.eup %837  ;;  %849 = vtanh.f32 %v375_v16  ;;  %v346_v29 = vmul.f32 %v330_v17, %v1087_v61  ;;  %v331_v30 = vmul.f32 %v315_v18, %v1098_v11  ;;  %v263_v31 = vmul.f32 %v1023_v49, %v229_v26  ;;  %v769_v32 = vpop.f32.mrb[14].mxu0 }
 0x120   :  { %v840_v34 = vpop.eup %839  ;;  %v364_v36 = vadd.f32 %v348_v22, %v1081_v56  ;;  %v349_v7 = vmul.f32 %v333_v24, %v1093_v2  ;;  %v1113_v37 = vadd.f32 %v1028_v51, %v265_v25  ;;  %v266_v38 = vmul.f32 %v769_v32, %v1023_v49  ;;  %v232_v39 = vpop.f32.mrb[15].mxu0 }
 0x121   :  { %v842_v40 = vpop.eup %841  ;;  %v362_v41 = vadd.f32 %v346_v29, %v1087_v61  ;;  %v347_v42 = vmul.f32 %v331_v30, %v1098_v11  ;;  %v1119_v43 = vadd.f32 %v1028_v51, %v263_v31  ;;  %v264_v44 = vmul.f32 %v1023_v49, %v232_v39 }
 0x122   :  { %v380_v45 = vmul.f32 0.7978846, %v364_v36  ;;  %v365_v46 = vadd.f32 %v349_v7, %v1093_v2  ;;  %v320_v47 = vmul.f32 0.044715, %v1113_v37  ;;  %v1125_v48 = vadd.f32 %v1028_v51, %v266_v38 }
 0x123   :  { %v378_v50 = vmul.f32 0.7978846, %v362_v41  ;;  %v363_v52 = vadd.f32 %v347_v42, %v1098_v11  ;;  %v318_v53 = vmul.f32 0.044715, %v1119_v43  ;;  %v1130_v54 = vadd.f32 %v1028_v51, %v264_v44 }
 0x124   :  { %851 = vtanh.f32 %v380_v45  ;;  %v381_v55 = vmul.f32 0.7978846, %v365_v46  ;;  %v336_v49 = vmul.f32 %v320_v47, %v1113_v37  ;;  %v321_v57 = vmul.f32 0.044715, %v1125_v48 }
 0x125   :  { %853 = vtanh.f32 %v378_v50  ;;  %v379_v58 = vmul.f32 0.7978846, %v363_v52  ;;  %v334_v59 = vmul.f32 %v318_v53, %v1119_v43  ;;  %v319_v60 = vmul.f32 0.044715, %v1130_v54 }
 0x126   :  { %v844_v62 = vpop.eup %843  ;;  %855 = vtanh.f32 %v381_v55  ;;  %v352_v63 = vmul.f32 %v336_v49, %v1113_v37  ;;  %v337_v0 = vmul.f32 %v321_v57, %v1125_v48  ;;  %v402_v51 = vadd.f32 1.0, %v838_v28 }
 0x127   :  { %v846_v1 = vpop.eup %845  ;;  %857 = vtanh.f32 %v379_v58  ;;  %v350_v5 = vmul.f32 %v334_v59, %v1119_v43  ;;  %v335_v6 = vmul.f32 %v319_v60, %v1130_v54  ;;  %v403_v8 = vadd.f32 1.0, %v842_v40 }
 0x128   :  { %v848_v12 = vpop.eup %847  ;;  %v368_v13 = vadd.f32 %v352_v63, %v1113_v37  ;;  %v353_v14 = vmul.f32 %v337_v0, %v1125_v48  ;;  %v418_v16 = vmul.f32 %v402_v51, %v1042_v9  ;;  %v404_v17 = vadd.f32 1.0, %v836_v21 }
 0x129   :  { %v850_v18 = vpop.eup %849  ;;  %v366_v19 = vadd.f32 %v350_v5, %v1119_v43  ;;  %v351_v22 = vmul.f32 %v335_v6, %v1130_v54  ;;  %v419_v24 = vmul.f32 %v403_v8, %v1050_v20  ;;  %v405_v25 = vadd.f32 1.0, %v840_v34 }
 0x12a   :  { %v384_v26 = vmul.f32 0.7978846, %v368_v13  ;;  %v369_v28 = vadd.f32 %v353_v14, %v1125_v48  ;;  %v435_v29 = vmul.f32 %v1038_v3, %v418_v16  ;;  %v420_v30 = vmul.f32 %v404_v17, %v1044_v10 }
 0x12b   :  { %v382_v31 = vmul.f32 0.7978846, %v366_v19  ;;  %v367_v32 = vadd.f32 %v351_v22, %v1130_v54  ;;  %v436_v9 = vmul.f32 %v1038_v3, %v419_v24  ;;  %v421_v21 = vmul.f32 %v405_v25, %v1047_v15 }
 0x12c   :  { %859 = vtanh.f32 %v384_v26  ;;  %v385_v36 = vmul.f32 0.7978846, %v369_v28  ;;  %v452_v7 = vadd.f32 %v1040_v4, %v435_v29  ;;  %v437_v20 = vmul.f32 %v1038_v3, %v420_v30 }
 0x12d   :  { %861 = vtanh.f32 %v382_v31  ;;  %v383_v34 = vmul.f32 0.7978846, %v367_v32  ;;  %v453_v38 = vadd.f32 %v1040_v4, %v436_v9  ;;  %v438_v39 = vmul.f32 %v1038_v3, %v421_v21 }
 0x12e   :  { %v852_v10 = vpop.eup %851  ;;  %863 = vtanh.f32 %v385_v36  ;;  %v818_v40 = vround.rtne.f32 %v452_v7  ;;  %v454_v41 = vadd.f32 %v1040_v4, %v437_v20  ;;  %v294_v42 = vmul.f32 0.5, %v1057_v27 }
 0x12f   :  { %v854_v15 = vpop.eup %853  ;;  %865 = vtanh.f32 %v383_v34  ;;  %v819_v44 = vround.rtne.f32 %v453_v38  ;;  %v455_v45 = vadd.f32 %v1040_v4, %v438_v39  ;;  %v295_v46 = vmul.f32 0.5, %v1066_v35 }
 0x130   :  { %v856_v47 = vpop.eup %855  ;;  %v484_v50 = vmax.f32 %v818_v40, 0.0  ;;  %v820_v52 = vround.rtne.f32 %v454_v41  ;;  %v406_v53 = vadd.f32 1.0, %v846_v1  ;;  %v407_v55 = vadd.f32 1.0, %v850_v18 }
 0x131   :  { %v858_v49 = vpop.eup %857  ;;  %v485_v57 = vmax.f32 %v819_v44, 0.0  ;;  %v821_v58 = vround.rtne.f32 %v455_v45  ;;  %v296_v59 = vmul.f32 0.5, %v1053_v23  ;;  %v297_v60 = vmul.f32 0.5, %v1062_v33 }
 0x132   :  { %v500_v27 = vmin.f32 %v484_v50, 255.0  ;;  %v486_v63 = vmax.f32 %v820_v52, 0.0  ;;  %v422_v0 = vmul.f32 %v406_v53, %v294_v42  ;;  %v423_v51 = vmul.f32 %v407_v55, %v295_v46 }
 0x133   :  { %v501_v5 = vmin.f32 %v485_v57, 255.0  ;;  %v487_v6 = vmax.f32 %v821_v58, 0.0  ;;  %v408_v8 = vadd.f32 1.0, %v844_v62  ;;  %v409_v35 = vadd.f32 1.0, %v848_v12 }
 0x134   :  { %v502_v13 = vmin.f32 %v486_v63, 255.0  ;;  %v439_v14 = vmul.f32 %v1038_v3, %v422_v0  ;;  %v440_v1 = vmul.f32 %v1038_v3, %v423_v51  ;;  %v298_v16 = vmul.f32 0.5, %v1087_v61 }
 0x135   :  { %v516_v17 = vpack.c.bf16 %v501_v5, %v500_v27  ;;  %v503_v18 = vmin.f32 %v487_v6, 255.0  ;;  %v424_v23 = vmul.f32 %v408_v8, %v296_v59  ;;  %v425_v19 = vmul.f32 %v409_v35, %v297_v60 }
 0x136   :  { %v1165_v33 = vpop.eup %859  ;;  %v456_v22 = vadd.f32 %v1040_v4, %v439_v14  ;;  %v457_v24 = vadd.f32 %v1040_v4, %v440_v1  ;;  %v299_v62 = vmul.f32 0.5, %v1098_v11  ;;  %v410_v12 = vadd.f32 1.0, %v854_v15 }
 0x137   :  { %v862_v25 = vpop.eup %861  ;;  %786 = vmatprep.mubr.bf16.mxu1 %v516_v17  ;;  %v517_v26 = vpack.c.bf16 %v503_v18, %v502_v13  ;;  %v441_v28 = vmul.f32 %v1038_v3, %v424_v23  ;;  %v442_v61 = vmul.f32 %v1038_v3, %v425_v19  ;;  %v411_v29 = vadd.f32 1.0, %v858_v49 }
 0x138   :  { %v864_v30 = vpop.eup %863  ;;  %v822_v31 = vround.rtne.f32 %v456_v22  ;;  %v823_v32 = vround.rtne.f32 %v457_v24  ;;  %v426_v9 = vmul.f32 %v410_v12, %v298_v16  ;;  %v300_v21 = vmul.f32 0.5, %v1081_v56 }
 0x139   :  { %v866_v36 = vpop.eup %865  ;;  %787 = vmatmul.mubr.bf16.vlgmr.msra.gmra.mrb[0].mxu1 %v517_v26  ;;  %v458_v7 = vadd.f32 %v1040_v4, %v441_v28  ;;  %v459_v11 = vadd.f32 %v1040_v4, %v442_v61  ;;  %v427_v20 = vmul.f32 %v411_v29, %v299_v62  ;;  %v301_v34 = vmul.f32 0.5, %v1093_v2 }
 0x13a   :  { %v488_v38 = vmax.f32 %v822_v31, 0.0  ;;  %v489_v39 = vmax.f32 %v823_v32, 0.0  ;;  %v443_v40 = vmul.f32 %v1038_v3, %v426_v9  ;;  %v412_v41 = vadd.f32 1.0, %v852_v10 }
 0x13b   :  { %v824_v42 = vround.rtne.f32 %v458_v7  ;;  %v825_v15 = vround.rtne.f32 %v459_v11  ;;  %v444_v44 = vmul.f32 %v1038_v3, %v427_v20  ;;  %v413_v45 = vadd.f32 1.0, %v856_v47 }
 0x13c   :  { %v504_v56 = vmin.f32 %v488_v38, 255.0  ;;  %v505_v46 = vmin.f32 %v489_v39, 255.0  ;;  %v460_v50 = vadd.f32 %v1040_v4, %v443_v40  ;;  %v428_v52 = vmul.f32 %v412_v41, %v300_v21 }
 0x13d   :  { %v490_v53 = vmax.f32 %v824_v42, 0.0  ;;  %v491_v55 = vmax.f32 %v825_v15, 0.0  ;;  %v461_v49 = vadd.f32 %v1040_v4, %v444_v44  ;;  %v429_v2 = vmul.f32 %v413_v45, %v301_v34 }
 0x13e   :  { %v518_v57 = vpack.c.bf16 %v505_v46, %v504_v56  ;;  %v826_v58 = vround.rtne.f32 %v460_v50  ;;  %v445_v59 = vmul.f32 %v1038_v3, %v428_v52  ;;  %v302_v10 = vmul.f32 0.5, %v1119_v43  ;;  %v704_v46 = vld [vmem:[%s1257_s6] ss:$0 sm:$0xff] }
 0x13f   :  { %v506_v60 = vmin.f32 %v490_v53, 255.0  ;;  %v507_v27 = vmin.f32 %v491_v55, 255.0  ;;  %v827_v63 = vround.rtne.f32 %v461_v49  ;;  %v446_v47 = vmul.f32 %v1038_v3, %v429_v2 }
 0x140   :  { %790 = vmatprep.mubr.bf16.mxu1 %v518_v57  ;;  %v492_v0 = vmax.f32 %v826_v58, 0.0  ;;  %v462_v51 = vadd.f32 %v1040_v4, %v445_v59  ;;  %v303_v5 = vmul.f32 0.5, %v1130_v54  ;;  %v414_v6 = vadd.f32 1.0, %v862_v25 }
 0x141   :  { %v519_v8 = vpack.c.bf16 %v507_v27, %v506_v60  ;;  %v493_v35 = vmax.f32 %v827_v63, 0.0  ;;  %v463_v13 = vadd.f32 %v1040_v4, %v446_v47  ;;  %v415_v14 = vadd.f32 1.0, %v866_v36 }
 0x142   :  { %v508_v1 = vmin.f32 %v492_v0, 255.0  ;;  %v828_v16 = vround.rtne.f32 %v462_v51  ;;  %v430_v43 = vmul.f32 %v414_v6, %v302_v10  ;;  %v304_v17 = vmul.f32 0.5, %v1113_v37 }
 0x143   :  { %791 = vmatmul.mubr.bf16.gmra.mrb[4].mxu1 %v519_v8  ;;  %v509_v18 = vmin.f32 %v493_v35, 255.0  ;;  %v829_v23 = vround.rtne.f32 %v463_v13  ;;  %v431_v19 = vmul.f32 %v415_v14, %v303_v5  ;;  %v305_v22 = vmul.f32 0.5, %v1125_v48 }
 0x144   :  { %v494_v24 = vmax.f32 %v828_v16, 0.0  ;;  %v447_v54 = vmul.f32 %v1038_v3, %v430_v43  ;;  %v416_v62 = vadd.f32 1.0, %v1165_v33  ;;  %v417_v12 = vadd.f32 1.0, %v864_v30 }
 0x145   :  { %v520_v25 = vpack.c.bf16 %v509_v18, %v508_v1  ;;  %v495_v26 = vmax.f32 %v829_v23, 0.0  ;;  %v448_v28 = vmul.f32 %v1038_v3, %v431_v19 }
 0x146   :  { %v464_v61 = vadd.f32 %v1040_v4, %v447_v54  ;;  %v432_v29 = vmul.f32 %v416_v62, %v304_v17  ;;  %v433_v37 = vmul.f32 %v417_v12, %v305_v22  ;;  %v510_v31 = vmin.f32 %v494_v24, 255.0 }
 0x147   :  { %794 = vmatprep.mubr.bf16.mxu1 %v520_v25  ;;  %v511_v32 = vmin.f32 %v495_v26, 255.0  ;;  %v465_v9 = vadd.f32 %v1040_v4, %v448_v28 }
 0x148   :  { %v830_v48 = vround.rtne.f32 %v464_v61  ;;  %v449_v21 = vmul.f32 %v1038_v3, %v432_v29  ;;  %v450_v36 = vmul.f32 %v1038_v3, %v433_v37 }
 0x149   :  { %v521_v33 = vpack.c.bf16 %v511_v32, %v510_v31  ;;  %v831_v30 = vround.rtne.f32 %v465_v9 }
 0x14a   :  { %v496_v7 = vmax.f32 %v830_v48, 0.0  ;;  %v466_v11 = vadd.f32 %v1040_v4, %v449_v21  ;;  %v467_v20 = vadd.f32 %v1040_v4, %v450_v36  ;;  %v705_v4 = vld [vmem:[%s1258_s7] ss:$0 sm:$0xff] }
 0x14b   :  { %795 = vmatmul.mubr.bf16.gmra.mrb[8].mxu1 %v521_v33  ;;  %v497_v34 = vmax.f32 %v831_v30, 0.0 }
 0x14c   :  { %v832_v38 = vround.rtne.f32 %v466_v11  ;;  %v833_v39 = vround.rtne.f32 %v467_v20  ;;  %v512_v40 = vmin.f32 %v496_v7, 255.0 }
 0x14d   :  { %v513_v41 = vmin.f32 %v497_v34, 255.0 }
 0x14e   :  { %v498_v42 = vmax.f32 %v832_v38, 0.0  ;;  %v499_v15 = vmax.f32 %v833_v39, 0.0 }
 0x14f   :  { %v522_v44 = vpack.c.bf16 %v513_v41, %v512_v40 }
 0x150   :  { %v514_v45 = vmin.f32 %v498_v42, 255.0  ;;  %v515_v56 = vmin.f32 %v499_v15, 255.0 }
 0x151   :  { %798 = vmatprep.mubr.bf16.mxu1 %v522_v44 }
 0x152   :  { %v523_v3 = vpack.c.bf16 %v515_v56, %v514_v45 }
 0x154   :  { %799 = vmatmul.mubr.bf16.gmra.mrb[12].mxu1 %v523_v3 }
 0x20c   :  { %v788_v50 = vpop.f32.mrb[0].mxu1 }
 0x20d   :  { %v642_v52 = vmul.f32 %v788_v50, %v704_v46  ;;  %v570_v53 = vpop.f32.mrb[1].mxu1 }
 0x20e   :  { %v640_v55 = vmul.f32 %v704_v46, %v570_v53  ;;  %v789_v49 = vpop.f32.mrb[2].mxu1 }
 0x20f   :  { %v665_v2 = vadd.f32 %v705_v4, %v642_v52  ;;  %v643_v57 = vmul.f32 %v789_v49, %v704_v46  ;;  %v573_v58 = vpop.f32.mrb[3].mxu1 }
 0x210   :  { %v663_v59 = vadd.f32 %v705_v4, %v640_v55  ;;  %v641_v10 = vmul.f32 %v704_v46, %v573_v58 }
 0x211   :  { %681 = vst [vmem:[%s1259_s8 + $0x10] sm:$0xff] %v665_v2  ;;  %v666_v60 = vadd.f32 %v705_v4, %v643_v57 }
 0x212   :  { %679 = vst [vmem:[%s1259_s8] sm:$0xff] %v663_v59  ;;  %v664_v27 = vadd.f32 %v705_v4, %v641_v10 }
 0x213   :  { %682 = vst [vmem:[%s1259_s8 + $0x18] sm:$0xff] %v666_v60 }
 0x214   :  { %680 = vst [vmem:[%s1259_s8 + $0x8] sm:$0xff] %v664_v27 }
 0x216   :  { %v792_v63 = vpop.f32.mrb[4].mxu1 }
 0x217   :  { %v646_v47 = vmul.f32 %v792_v63, %v704_v46  ;;  %v586_v0 = vpop.f32.mrb[5].mxu1 }
 0x218   :  { %v644_v51 = vmul.f32 %v704_v46, %v586_v0  ;;  %v793_v5 = vpop.f32.mrb[6].mxu1 }
 0x219   :  { %v669_v6 = vadd.f32 %v705_v4, %v646_v47  ;;  %v647_v8 = vmul.f32 %v793_v5, %v704_v46  ;;  %v589_v35 = vpop.f32.mrb[7].mxu1 }
 0x21a   :  { %v667_v13 = vadd.f32 %v705_v4, %v644_v51  ;;  %v645_v14 = vmul.f32 %v704_v46, %v589_v35 }
 0x21b   :  { %685 = vst [vmem:[%s1259_s8 + $0x30] sm:$0xff] %v669_v6  ;;  %v670_v1 = vadd.f32 %v705_v4, %v647_v8 }
 0x21c   :  { %683 = vst [vmem:[%s1259_s8 + $0x20] sm:$0xff] %v667_v13  ;;  %v668_v16 = vadd.f32 %v705_v4, %v645_v14 }
 0x21d   :  { %686 = vst [vmem:[%s1259_s8 + $0x38] sm:$0xff] %v670_v1 }
 0x21e   :  { %684 = vst [vmem:[%s1259_s8 + $0x28] sm:$0xff] %v668_v16  ;;  %v796_v43 = vpop.f32.mrb[8].mxu1 }
 0x21f   :  { %v650_v17 = vmul.f32 %v796_v43, %v704_v46  ;;  %v602_v18 = vpop.f32.mrb[9].mxu1 }
 0x220   :  { %v648_v23 = vmul.f32 %v704_v46, %v602_v18  ;;  %v797_v19 = vpop.f32.mrb[10].mxu1 }
 0x221   :  { %v673_v22 = vadd.f32 %v705_v4, %v650_v17  ;;  %v651_v24 = vmul.f32 %v797_v19, %v704_v46  ;;  %v605_v54 = vpop.f32.mrb[11].mxu1 }
 0x222   :  { %v671_v62 = vadd.f32 %v705_v4, %v648_v23  ;;  %v649_v12 = vmul.f32 %v704_v46, %v605_v54 }
 0x223   :  { %689 = vst [vmem:[%s1259_s8 + $0x50] sm:$0xff] %v673_v22  ;;  %v674_v25 = vadd.f32 %v705_v4, %v651_v24 }
 0x224   :  { %687 = vst [vmem:[%s1259_s8 + $0x40] sm:$0xff] %v671_v62  ;;  %v672_v26 = vadd.f32 %v705_v4, %v649_v12 }
 0x225   :  { %690 = vst [vmem:[%s1259_s8 + $0x58] sm:$0xff] %v674_v25 }
 0x226   :  { %688 = vst [vmem:[%s1259_s8 + $0x48] sm:$0xff] %v672_v26 }
 0x227   :  { %v800_v28 = vpop.f32.mrb[12].mxu1 }
 0x228   :  { %v654_v61 = vmul.f32 %v800_v28, %v704_v46  ;;  %v618_v29 = vpop.f32.mrb[13].mxu1 }
 0x229   :  { %v652_v37 = vmul.f32 %v704_v46, %v618_v29  ;;  %v801_v31 = vpop.f32.mrb[14].mxu1 }
 0x22a   :  { %v677_v32 = vadd.f32 %v705_v4, %v654_v61  ;;  %v655_v9 = vmul.f32 %v801_v31, %v704_v46  ;;  %v621_v48 = vpop.f32.mrb[15].mxu1 }
 0x22b   :  { %v675_v21 = vadd.f32 %v705_v4, %v652_v37  ;;  %v653_v36 = vmul.f32 %v704_v46, %v621_v48 }
 0x22c   :  { %693 = vst [vmem:[%s1259_s8 + $0x70] sm:$0xff] %v677_v32  ;;  %v678_v33 = vadd.f32 %v705_v4, %v655_v9 }
 0x22d   :  { %691 = vst [vmem:[%s1259_s8 + $0x60] sm:$0xff] %v675_v21  ;;  %v676_v30 = vadd.f32 %v705_v4, %v653_v36 }
 0x22e   :  { %694 = vst [vmem:[%s1259_s8 + $0x78] sm:$0xff] %v678_v33 }
 0x22f   :  { %692 = vst [vmem:[%s1259_s8 + $0x68] sm:$0xff] %v676_v30 }
 0x230   :  { %699 = vsyncpa [#allocation3], 1 }

</bundles_post_ra>
